<compile_context>
chip_gen: v5e
topology: v5e:2x2
jax: 0.10.0
libtpu: 0.0.40
codegen_flags: <defaults>
</compile_context>

<pallas_src>
import functools

import jax
import jax.numpy as jnp
from jax.experimental import pallas as pl
from jax.experimental.pallas import tpu as pltpu


def _round_up(x, m):
    return ((x + m - 1) // m) * m


def _supcon_kernel(x_row_ref, x_col_ref, lab_a_ref, lab_b_ref, out_ref,
                   row_op_ref, num_ref, den_ref, *, inv_t, mxu_dtype):
    """One (TM, TN) tile of exp(cos/T), accumulated per anchor row.

    out[i] = log(sum_{k != i} e_ik) - log(sum_{j in pos(i)} e_ij)
    (the log(#pos) mean-correction and masking happen in the wrapper).
    """
    i = pl.program_id(0)
    j = pl.program_id(1)
    nj = pl.num_programs(1)
    tm = x_row_ref.shape[0]
    tn = x_col_ref.shape[0]

    @pl.when(j == 0)
    def _init():
        # Anchors are already L2-normalized (wrapper); fold 1/T into the MXU
        # operand once per row tile so no (TM, TN) scale is ever needed.
        row_op_ref[...] = (x_row_ref[...].astype(jnp.float32) * inv_t).astype(mxu_dtype)
        num_ref[...] = jnp.zeros_like(num_ref)
        den_ref[...] = jnp.zeros_like(den_ref)

    # s = (xn_i / T) . xn_k on the MXU, f32 accumulation.
    xc = x_col_ref[...].astype(mxu_dtype)                            # (TN, H)
    s = jax.lax.dot_general(row_op_ref[...], xc,
                            (((1,), (1,)), ((), ())),
                            preferred_element_type=jnp.float32)      # (TM, TN)

    lab_a = lab_a_ref[...]                                           # (TM, 1)
    lab_b = lab_b_ref[...]                                           # (1, TN)
    # One broadcast add folds the max-shift (-1/T, keeps e <= ~1 for any T)
    # and the key-padding mask (padded key columns carry label -2 -> exp == 0).
    bias = jnp.where(lab_b >= 0, -inv_t, -1e30).astype(jnp.float32)

    # Exclude the self term exactly via a global-index compare (VPU work that
    # hides under the exp-bound EUP) — precision-independent, no NaN hazard.
    rows = i * tm + jax.lax.broadcasted_iota(jnp.int32, (tm, tn), 0)
    cols = j * tn + jax.lax.broadcasted_iota(jnp.int32, (tm, tn), 1)
    e = jnp.where(rows != cols, jnp.exp(s + bias), 0.0)              # (TM, TN)

    # Row sums (XLU).  If a bundle dump ever shows the XLU binding, these can
    # be offloaded to the idle MXU as dots against a ones-vector.
    den_ref[...] += jnp.sum(e, axis=1, keepdims=True)
    same = lab_a == lab_b
    num_ref[...] += jnp.sum(jnp.where(same, e, 0.0), axis=1, keepdims=True)

    @pl.when(j == nj - 1)
    def _fin():
        # Anchors without positives give num == 0; clamp so the log stays
        # finite — the wrapper masks those anchors out of the final mean.
        num = jnp.maximum(num_ref[...], 1e-30)
        den = jnp.maximum(den_ref[...], 1e-30)
        out_ref[...] = jnp.log(den) - jnp.log(num)


def sup_contrastive_loss(utter_emb, labels, temperature=0.1):
    """utter_emb: (N, H) float (f32 or bf16), labels: (N,) non-negative class ids.

    Returns the scalar supervised contrastive loss (f32).
    """
    x = jnp.asarray(utter_emb)
    n, h = x.shape
    lab = jnp.asarray(labels, jnp.int32)
    # NOTE: real labels must be non-negative class indices (as in the module);
    # -1 / -2 below are reserved sentinels for row / column padding.

    # Pre-normalize once (perf review): one bandwidth-trivial O(N*H) XLA pass,
    # so the kernel's inner step is pure matmul + exp + reduce (the O(N^2) part).
    xf = x.astype(jnp.float32)
    xn = xf * jax.lax.rsqrt(jnp.maximum(jnp.sum(xf * xf, axis=1, keepdims=True), 1e-24))
    xn = xn.astype(x.dtype)          # DMA'd in the input's native dtype

    mxu_dtype = jnp.bfloat16 if x.dtype == jnp.bfloat16 else jnp.float32
    itemsize = x.dtype.itemsize
    mxu_itemsize = jnp.dtype(mxu_dtype).itemsize
    sub = 16 if x.dtype == jnp.bfloat16 else 8      # bf16 packs 16 sublanes/vreg

    # --- tile selection -------------------------------------------------------
    # Budget double-buffered input tiles + row_op scratch to ~20 MiB so the
    # kernel fits comfortably inside v7x's 64 MiB physical VMEM.
    budget = 20 * 2**20
    small_pad = _round_up(n, 2 * sub)
    if n <= 512 and 2 * (small_pad + small_pad // 2) * h * itemsize <= budget:
        n_pad = small_pad
        tm, tn = n_pad // 2, n_pad       # >= 2 row tiles -> both v7x TCs get work
    else:
        n_pad = _round_up(n, 256)
        tm = tn = 256
        while (2 * (tm + tn) * h * itemsize + tm * h * mxu_itemsize > budget
               and tn > 128):
            tn //= 2
        if 2 * (tm + tn) * h * itemsize + tm * h * mxu_itemsize > budget and tm > 128:
            tm = 128

    pad = n_pad - n
    if pad:
        xn = jnp.pad(xn, ((0, pad), (0, 0)))
    # Padded anchors get label -1, padded keys get -2 (never equal to a real
    # class index and never equal to each other -> padded rows/cols drop out).
    lab_rows = jnp.pad(lab, (0, pad), constant_values=-1).reshape(n_pad, 1)
    lab_cols = jnp.pad(lab, (0, pad), constant_values=-2).reshape(1, n_pad)

    # VMEM limit derived from the real footprint, capped well below v7x's 64 MiB.
    est = (2 * (tm + tn) * h * itemsize          # double-buffered x tiles
           + tm * h * mxu_itemsize               # row_op scratch
           + 6 * tm * tn * 4                     # e-slab / mask intermediates
           + 16 * tm * 4)                        # accumulators, labels, output
    vmem_limit = int(min(48 * 2**20, max(3 * est // 2, 16 * 2**20)))

    kernel = functools.partial(_supcon_kernel,
                               inv_t=float(1.0 / temperature),
                               mxu_dtype=mxu_dtype)

    core = pl.pallas_call(
        kernel,
        out_shape=jax.ShapeDtypeStruct((n_pad, 1), jnp.float32),
        grid_spec=pltpu.PrefetchScalarGridSpec(
            num_scalar_prefetch=0,
            grid=(n_pad // tm, n_pad // tn),
            in_specs=[
                pl.BlockSpec((tm, h), lambda i, j: (i, 0)),   # anchor rows
                pl.BlockSpec((tn, h), lambda i, j: (j, 0)),   # key rows
                pl.BlockSpec((tm, 1), lambda i, j: (i, 0)),   # anchor labels
                pl.BlockSpec((1, tn), lambda i, j: (0, j)),   # key labels
            ],
            out_specs=pl.BlockSpec((tm, 1), lambda i, j: (i, 0)),
            scratch_shapes=[
                pltpu.VMEM((tm, h), mxu_dtype),    # 1/T-scaled anchor tile
                pltpu.VMEM((tm, 1), jnp.float32),  # numerator accumulator
                pltpu.VMEM((tm, 1), jnp.float32),  # denominator accumulator
            ],
        ),
        compiler_params=pltpu.CompilerParams(
            dimension_semantics=("parallel", "arbitrary"),  # row tiles across TCs
            vmem_limit_bytes=vmem_limit,
        ),
    )(xn, xn, lab_rows, lab_cols)

    # Per-anchor positive counts are a pure function of labels -> tiny XLA op
    # here instead of a per-step (TM,TN) cast + XLU reduce inside the kernel.
    cnt = jnp.sum(lab[:, None] == lab[None, :], axis=1).astype(jnp.float32) - 1.0
    has_pos = cnt > 0.0
    # loss_i = log(#pos_i) + log(denom_i) - log(sum_pos_i)   (numerator is a mean)
    loss_i = core[:n, 0] + jnp.log(jnp.maximum(cnt, 1.0))
    # NOTE: if no anchor has any positive, this is 0/0 = NaN (same as reference).
    return jnp.sum(jnp.where(has_pos, loss_i, 0.0)) / jnp.sum(has_pos.astype(jnp.float32))


def _reference(utter_emb, labels, temperature=0.1):
    """Pure-JAX reference mirroring the PyTorch loop semantics (vectorized).

    Uses Precision.HIGHEST so it is the accurate baseline; the kernel keeps the
    default (fast) MXU matmul precision, hence the modest test tolerances below.
    """
    x = jnp.asarray(utter_emb, jnp.float32)
    xn = x / jnp.maximum(jnp.linalg.norm(x, axis=1, keepdims=True), 1e-12)
    sim = jnp.dot(xn, xn.T, precision=jax.lax.Precision.HIGHEST)
    e = jnp.exp(sim / temperature)
    n = x.shape[0]
    same = labels[:, None] == labels[None, :]
    eye = jnp.eye(n, dtype=bool)
    pos = same & ~eye
    pc = pos.sum(axis=1)
    numer = (e * pos).sum(axis=1) / jnp.maximum(pc, 1)
    denom = (e * ~eye).sum(axis=1)
    li = -jnp.log(numer / denom)
    hp = pc > 0
    return jnp.sum(jnp.where(hp, li, 0.0)) / hp.sum()


if __name__ == "__main__":
    key = jax.random.PRNGKey(0)
    k1, k2, k3 = jax.random.split(key, 3)

    # Tolerances: the kernel's similarity matmul runs at the TPU's default
    # (fast) MXU precision (~bf16 products), the reference at HIGHEST; with
    # T=0.1 that yields O(1e-2) absolute differences on an O(1-3) loss, which
    # the tolerances below cover while still catching any structural bug.

    # --- tiny case matching the module's typical mini-batch use ---------------
    N, H = 8, 32
    x_small = jax.random.normal(k1, (N, H), dtype=jnp.float32)
    lab_small = jnp.array([0, 1, 2, 0, 1, 2, 0, 1], dtype=jnp.int32)
    loss = jax.block_until_ready(sup_contrastive_loss(x_small, lab_small, 0.1))
    ref = _reference(x_small, lab_small, 0.1)
    assert jnp.isfinite(loss), "kernel produced non-finite loss"
    assert jnp.allclose(loss, ref, atol=5e-2, rtol=5e-2), (loss, ref)

    # --- larger case exercising the tiled grid path + row/col padding ---------
    N2, H2 = 700, 64
    x_big = jax.random.normal(k2, (N2, H2), dtype=jnp.float32)
    lab_big = jax.random.randint(k3, (N2,), 0, 5, dtype=jnp.int32)
    loss2 = jax.block_until_ready(sup_contrastive_loss(x_big, lab_big, 0.1))
    ref2 = _reference(x_big, lab_big, 0.1)
    assert jnp.isfinite(loss2), "kernel produced non-finite loss (tiled path)"
    assert jnp.allclose(loss2, ref2, atol=5e-2, rtol=5e-2), (loss2, ref2)

    # --- bf16 inputs: native-dtype DMA + bf16 MXU path -------------------------
    x_bf16 = x_big.astype(jnp.bfloat16)
    loss3 = jax.block_until_ready(sup_contrastive_loss(x_bf16, lab_big, 0.1))
    ref3 = _reference(x_bf16.astype(jnp.float32), lab_big, 0.1)
    assert jnp.isfinite(loss3), "kernel produced non-finite loss (bf16 path)"
    assert jnp.allclose(loss3, ref3, atol=1e-1, rtol=1e-1), (loss3, ref3)

    print("KERNEL_OK")
</pallas_src>

<mosaic_0001>
module attributes {stable_mosaic.version = 11 : i64} {
  func.func @_supcon_kernel(%arg0: i32, %arg1: i32, %arg2: memref<8x32xf32, #tpu.memory_space<vmem>>, %arg3: memref<16x32xf32, #tpu.memory_space<vmem>>, %arg4: memref<8x1xi32, #tpu.memory_space<vmem>>, %arg5: memref<1x16xi32, #tpu.memory_space<vmem>>, %arg6: memref<8x1xf32, #tpu.memory_space<vmem>>, %arg7: memref<8x32xf32, #tpu.memory_space<vmem>>, %arg8: memref<8x1xf32, #tpu.memory_space<vmem>>, %arg9: memref<8x1xf32, #tpu.memory_space<vmem>>) attributes {dimension_semantics = [#tpu.dimension_semantics<parallel>, #tpu.dimension_semantics<arbitrary>], iteration_bounds = array<i64: 2, 1>, scalar_prefetch = 0 : i64, scratch_operands = 3 : i64, tpu.core_type = #tpu.core_type<tc>, window_params = [{transform_indices = @transform_0, window_bounds = array<i64: 8, 32>}, {transform_indices = @transform_1, window_bounds = array<i64: 16, 32>}, {transform_indices = @transform_2, window_bounds = array<i64: 8, 1>}, {transform_indices = @transform_3, window_bounds = array<i64: 1, 16>}, {transform_indices = @transform_4, window_bounds = array<i64: 8, 1>}]} {
    %c0_i32 = arith.constant 0 : i32
    %0 = arith.cmpi eq, %arg1, %c0_i32 : i32
    %1 = arith.extui %0 : i1 to i32
    %c0_i32_0 = arith.constant 0 : i32
    %2 = arith.cmpi ne, %1, %c0_i32_0 : i32
    scf.if %2 {
      %c0_25 = arith.constant 0 : index
      %c0_26 = arith.constant 0 : index
      %45 = vector.load %arg2[%c0_25, %c0_26] : memref<8x32xf32, #tpu.memory_space<vmem>>, vector<8x32xf32>
      %cst_27 = arith.constant 1.000000e+01 : f32
      %46 = vector.broadcast %cst_27 : f32 to vector<8x32xf32>
      %47 = arith.mulf %45, %46 : vector<8x32xf32>
      %c0_28 = arith.constant 0 : index
      %c0_29 = arith.constant 0 : index
      %48 = vector.load %arg7[%c0_28, %c0_29] : memref<8x32xf32, #tpu.memory_space<vmem>>, vector<8x32xf32>
      tpu.vector_store %arg7[%c0_28, %c0_29], %47 {strides = array<i32>} : memref<8x32xf32, #tpu.memory_space<vmem>>, vector<8x32xf32>,
      %cst_30 = arith.constant 0.000000e+00 : f32
      %49 = vector.broadcast %cst_30 : f32 to vector<8x1xf32>
      %c0_31 = arith.constant 0 : index
      %c0_32 = arith.constant 0 : index
      %50 = vector.load %arg8[%c0_31, %c0_32] : memref<8x1xf32, #tpu.memory_space<vmem>>, vector<8x1xf32>
      tpu.vector_store %arg8[%c0_31, %c0_32], %49 {strides = array<i32>} : memref<8x1xf32, #tpu.memory_space<vmem>>, vector<8x1xf32>,
      %cst_33 = arith.constant 0.000000e+00 : f32
      %51 = vector.broadcast %cst_33 : f32 to vector<8x1xf32>
      %c0_34 = arith.constant 0 : index
      %c0_35 = arith.constant 0 : index
      %52 = vector.load %arg9[%c0_34, %c0_35] : memref<8x1xf32, #tpu.memory_space<vmem>>, vector<8x1xf32>
      tpu.vector_store %arg9[%c0_34, %c0_35], %51 {strides = array<i32>} : memref<8x1xf32, #tpu.memory_space<vmem>>, vector<8x1xf32>,
    } else {
    }
    %c0 = arith.constant 0 : index
    %c0_1 = arith.constant 0 : index
    %3 = vector.load %arg3[%c0, %c0_1] : memref<16x32xf32, #tpu.memory_space<vmem>>, vector<16x32xf32>
    %c0_2 = arith.constant 0 : index
    %c0_3 = arith.constant 0 : index
    %4 = vector.load %arg7[%c0_2, %c0_3] : memref<8x32xf32, #tpu.memory_space<vmem>>, vector<8x32xf32>
    %cst = arith.constant dense<0.000000e+00> : vector<8x16xf32>
    %5 = tpu.matmul %4, %3, %cst {dimension_numbers = #tpu.dot_dimension_numbers<[1], [1], [0], [0], [0, 0, 1, 0], [], []>} : vector<8x32xf32>, vector<16x32xf32>, vector<8x16xf32> -> vector<8x16xf32>
    %c0_4 = arith.constant 0 : index
    %c0_5 = arith.constant 0 : index
    %6 = vector.load %arg4[%c0_4, %c0_5] : memref<8x1xi32, #tpu.memory_space<vmem>>, vector<8x1xi32>
    %c0_6 = arith.constant 0 : index
    %c0_7 = arith.constant 0 : index
    %7 = vector.load %arg5[%c0_6, %c0_7] : memref<1x16xi32, #tpu.memory_space<vmem>>, vector<1x16xi32>
    %c0_i32_8 = arith.constant 0 : i32
    %8 = vector.broadcast %c0_i32_8 : i32 to vector<1x16xi32>
    %9 = arith.cmpi sge, %7, %8 : vector<1x16xi32>
    %cst_9 = arith.constant -1.000000e+01 : f32
    %cst_10 = arith.constant -1.000000e+30 : f32
    %10 = vector.broadcast %cst_9 : f32 to vector<1x16xf32>
    %11 = vector.broadcast %cst_10 : f32 to vector<1x16xf32>
    %12 = arith.select %9, %10, %11 : vector<1x16xi1>, vector<1x16xf32>
    %c8_i32 = arith.constant 8 : i32
    %13 = arith.muli %arg0, %c8_i32 : i32
    %14 = tpu.iota {dimensions = array<i32: 0>} : vector<8x16xi32>
    %15 = vector.broadcast %13 : i32 to vector<8x16xi32>
    %16 = arith.addi %15, %14 : vector<8x16xi32>
    %c16_i32 = arith.constant 16 : i32
    %17 = arith.muli %arg1, %c16_i32 : i32
    %18 = tpu.iota {dimensions = array<i32: 1>} : vector<8x16xi32>
    %19 = vector.broadcast %17 : i32 to vector<8x16xi32>
    %20 = arith.addi %19, %18 : vector<8x16xi32>
    %21 = arith.cmpi ne, %16, %20 : vector<8x16xi32>
    %22 = vector.broadcast %12 : vector<1x16xf32> to vector<8x16xf32>
    %23 = arith.addf %5, %22 : vector<8x16xf32>
    %24 = math.exp %23 : vector<8x16xf32>
    %cst_11 = arith.constant 0.000000e+00 : f32
    %25 = vector.broadcast %cst_11 : f32 to vector<8x16xf32>
    %26 = arith.select %21, %24, %25 : vector<8x16xi1>, vector<8x16xf32>
    %c0_12 = arith.constant 0 : index
    %c0_13 = arith.constant 0 : index
    %27 = vector.load %arg9[%c0_12, %c0_13] : memref<8x1xf32, #tpu.memory_space<vmem>>, vector<8x1xf32>
    %cst_14 = arith.constant dense<0.000000e+00> : vector<8xf32>
    %28 = vector.multi_reduction <add>, %26, %cst_14 [1] : vector<8x16xf32> to vector<8xf32>
    %29 = vector.shape_cast %28 : vector<8xf32> to vector<8x1xf32>
    %30 = arith.addf %27, %29 : vector<8x1xf32>
    %c0_15 = arith.constant 0 : index
    %c0_16 = arith.constant 0 : index
    %31 = vector.load %arg9[%c0_15, %c0_16] : memref<8x1xf32, #tpu.memory_space<vmem>>, vector<8x1xf32>
    tpu.vector_store %arg9[%c0_15, %c0_16], %30 {strides = array<i32>} : memref<8x1xf32, #tpu.memory_space<vmem>>, vector<8x1xf32>,
    %32 = vector.broadcast %6 : vector<8x1xi32> to vector<8x16xi32>
    %33 = vector.broadcast %7 : vector<1x16xi32> to vector<8x16xi32>
    %34 = arith.cmpi eq, %32, %33 : vector<8x16xi32>
    %c0_17 = arith.constant 0 : index
    %c0_18 = arith.constant 0 : index
    %35 = vector.load %arg8[%c0_17, %c0_18] : memref<8x1xf32, #tpu.memory_space<vmem>>, vector<8x1xf32>
    %cst_19 = arith.constant 0.000000e+00 : f32
    %36 = vector.broadcast %cst_19 : f32 to vector<8x16xf32>
    %37 = arith.select %34, %26, %36 : vector<8x16xi1>, vector<8x16xf32>
    %cst_20 = arith.constant dense<0.000000e+00> : vector<8xf32>
    %38 = vector.multi_reduction <add>, %37, %cst_20 [1] : vector<8x16xf32> to vector<8xf32>
    %39 = vector.shape_cast %38 : vector<8xf32> to vector<8x1xf32>
    %40 = arith.addf %35, %39 : vector<8x1xf32>
    %c0_21 = arith.constant 0 : index
    %c0_22 = arith.constant 0 : index
    %41 = vector.load %arg8[%c0_21, %c0_22] : memref<8x1xf32, #tpu.memory_space<vmem>>, vector<8x1xf32>
    tpu.vector_store %arg8[%c0_21, %c0_22], %40 {strides = array<i32>} : memref<8x1xf32, #tpu.memory_space<vmem>>, vector<8x1xf32>,
    %c0_i32_23 = arith.constant 0 : i32
    %42 = arith.cmpi eq, %arg1, %c0_i32_23 : i32
    %43 = arith.extui %42 : i1 to i32
    %c0_i32_24 = arith.constant 0 : i32
    %44 = arith.cmpi ne, %43, %c0_i32_24 : i32
    scf.if %44 {
      %c0_25 = arith.constant 0 : index
      %c0_26 = arith.constant 0 : index
      %45 = vector.load %arg8[%c0_25, %c0_26] : memref<8x1xf32, #tpu.memory_space<vmem>>, vector<8x1xf32>
      %cst_27 = arith.constant 1.000000e-30 : f32
      %46 = vector.broadcast %cst_27 : f32 to vector<8x1xf32>
      %47 = arith.maximumf %45, %46 : vector<8x1xf32>
      %c0_28 = arith.constant 0 : index
      %c0_29 = arith.constant 0 : index
      %48 = vector.load %arg9[%c0_28, %c0_29] : memref<8x1xf32, #tpu.memory_space<vmem>>, vector<8x1xf32>
      %cst_30 = arith.constant 1.000000e-30 : f32
      %49 = vector.broadcast %cst_30 : f32 to vector<8x1xf32>
      %50 = arith.maximumf %48, %49 : vector<8x1xf32>
      %51 = math.log %50 : vector<8x1xf32>
      %52 = math.log %47 : vector<8x1xf32>
      %53 = arith.subf %51, %52 : vector<8x1xf32>
      %c0_31 = arith.constant 0 : index
      %c0_32 = arith.constant 0 : index
      %54 = vector.load %arg6[%c0_31, %c0_32] : memref<8x1xf32, #tpu.memory_space<vmem>>, vector<8x1xf32>
      tpu.vector_store %arg6[%c0_31, %c0_32], %53 {strides = array<i32>} : memref<8x1xf32, #tpu.memory_space<vmem>>, vector<8x1xf32>,
    } else {
    }
    return
  }
  func.func @transform_0(%arg0: i32, %arg1: i32) -> (i32, i32) {
    %c0_i32 = arith.constant 0 : i32
    %c0_i32_0 = arith.constant 0 : i32
    return %arg0, %c0_i32 : i32, i32
  }
  func.func @transform_1(%arg0: i32, %arg1: i32) -> (i32, i32) {
    %c0_i32 = arith.constant 0 : i32
    %c0_i32_0 = arith.constant 0 : i32
    return %arg1, %c0_i32 : i32, i32
  }
  func.func @transform_2(%arg0: i32, %arg1: i32) -> (i32, i32) {
    %c0_i32 = arith.constant 0 : i32
    %c0_i32_0 = arith.constant 0 : i32
    return %arg0, %c0_i32 : i32, i32
  }
  func.func @transform_3(%arg0: i32, %arg1: i32) -> (i32, i32) {
    %c0_i32 = arith.constant 0 : i32
    %c0_i32_0 = arith.constant 0 : i32
    return %c0_i32, %arg1 : i32, i32
  }
  func.func @transform_4(%arg0: i32, %arg1: i32) -> (i32, i32) {
    %c0_i32 = arith.constant 0 : i32
    %c0_i32_0 = arith.constant 0 : i32
    return %arg0, %c0_i32 : i32, i32
  }
}

</mosaic_0001>

<bundles_post_ra>
// kernel: tpu_custom_call.1
= control target key start
LH: loop header
LB: loop body
LE: loop exit
PB: predicated region body
PF: predicated region fallthrough
CT: control target
= control target key end

     0   :  { %9 = vsyncpa [#allocation6], 0  ;;  %s614_s15 = smov 0   ;;  %s616_s16 = smov 0   ;;  %s675_s0 = inlined_call_operand.vmem [shape: f32[16,32], index: 0, kind: input, shape index: {}]   ;;  %s676_s1 = inlined_call_operand.hbm [shape: f32[16,32], index: 1, kind: input, shape index: {}]   ;;  %s677_s2 = inlined_call_operand.vmem [shape: s32[16,1], index: 2, kind: input, shape index: {}]   ;;  %s678_s3 = inlined_call_operand.vmem [shape: s32[1,16], index: 3, kind: input, shape index: {}]   ;;  %s679_s4 = inlined_call_operand.vmem [shape: f32[16,1], index: 4, kind: output, shape index: {}]  }
   0x1   :  { %s618_s17 = smov 0  }
   0x2 LB: > { %s460_s18 = sadd.s32 4294967295, %s581_s17   ;;  %s27_s19 = sadd.s32 1, %s577_s16  ;;  %s581_s17 = sphi %s618_s17, %s15_s17   ;;  %s577_s16 = sphi %s616_s16, %s681_s16   ;;  %s573_s15 = sphi %s614_s15, %s680_s15  }
   0x3   : > { %p29_p0 = scmp.ge.s32.totalorder %s27_s19, 2  ;;  %p462_p1 = scmp.ge.s32.totalorder %s581_s17, 1 }
   0x4   : > { %p162_p2 = scmp.lt.s32.totalorder %s581_s17, 3  ;;  %p485_p4 = scmp.eq.s32.totalorder %s460_s18, 0 }
   0x5   : > { %s683_s19 = smov (%p29_p0, %s27_s19), 0  ;;  %s176_s22 = sshll.u32 %s676_s1, 4  ;;  %s177_s22 = int_to_ptr.hbm [resolvable:$true] %s176_s22 }
   0x6   : > { %p163_p3 = pnand %p462_p1, %p162_p2  ;;  %s583_s23 = smov [#allocation5]  }
   0x7   : > { %s178_s24 = sshll.u32 %s583_s23, 4  ;;  %s584_s25 = smov 128   ;;  %s179_s24 = int_to_ptr.vmem [resolvable:$true] %s178_s24 }
   0x8   : > { %p481_p5 = pneg %p163_p3  ;;  %s585_s26 = smov 8  }
   0x9   : > { %214 = sbr.rel (%p163_p3) target bundleno = 312 (0x138), region = 36 }
   0xa   : > { %p482_p6 = pnand %p485_p4, %p481_p5 }
   0xc   : > { %484 = dma.hbm_to_vmem [thread:$0]  (!%p482_p6), %s177_s22, 256, %s179_s24, [#allocation6], %s584_s25, %s584_s25, %s585_s26  }
   0xe   : > { %568 = dma.done.wait (%p485_p4), [#allocation6], 256  }
   0xf   : > { %570 = vsyncadd (%p485_p4), [#allocation6], 4294967040  ;;  %p246_p7 = scmp.lt.s32.totalorder %s573_s15, 1  ;;  %v586_v0 = vmov 0   ;;  %vm268_vm0 = vcmask 261120   ;;  %v274_v2 = vld [vmem:[#allocation5 + $0x8] sm:$0xff]  ;;  %v281_v12 = vlaneseq }
  0x10   : > { %517 = vset.pattern.permute.xlu0 %v586_v0  ;;  %472 = vmatpush.xpose.msk.msra.mxu0 %vm268_vm0, %v274_v2  ;;  %v273_v5 = vld [vmem:[#allocation5] sm:$0xff]  ;;  %vm270_vm1 = vcmask 7168   ;;  %v587_v7 = vmov 0.0   ;;  %v277_v8 = vld [vmem:[%s678_s3] sm:$0x1]  ;;  %s471_s11 = sshll.u32 %s573_s15, 3 }
  0x11   : > { %s247_s27 = scalar_select %p246_p7, %s573_s15, 1  ;;  %272 = vst.msk [vmem:[#allocation4] sm:$0xff] %vm270_vm1, %v587_v7  ;;  %vm278_vm2 = vcmp.ge.s32.totalorder %v277_v8, 0  ;;  %v588_v9 = vmov -1e+30   ;;  %v282_v15 = vshrl.u32 %v281_v12, 7  ;;  %v283_v16 = vstv %s471_s11 }
  0x12   : > { %271 = vst.msk [vmem:[#allocation3] sm:$0xff] %vm270_vm1, %v587_v7  ;;  %v279_v10 = vsel %vm278_vm2, -10.0, %v588_v9  ;;  %v287_v19 = vand.u32 127, %v281_v12  ;;  %v518_v20 = vld [vmem:[%s678_s3] ss:$0 sm:$0xff]  ;;  %vm328_vm5 = vcmask 130048  }
  0x13   : > { %s640_s28 = sshll.u32 %s247_s27, 3  ;;  %v292_v11 = vperm.slane %v279_v10, 0  ;;  %v284_v18 = vadd.s32 %v283_v16, %v282_v15 }
  0x14   : > { %s249_s5 = scalar_lea.vmem %s675_s0, %s640_s28  ;;  %s254_s8 = scalar_lea.vmem %s677_s2, %s640_s28  ;;  %473 = vmatpush.xpose.msk.msra.mxu0 %vm268_vm0, %v273_v5 }
  0x15   : > { %v266_v1 = vld [vmem:[%s249_s5] sm:$0xff]  ;;  %vm290_vm3 = vcmp.ne.s32.totalorder %v284_v18, %v287_v19  ;;  %s261_s18 = scalar_lea.vmem %s679_s4, %s640_s28 }
  0x16   : > { %v267_v3 = vmul.f32 10.0, %v266_v1  ;;  %v276_v4 = vld [vmem:[%s254_s8] sm:$0xff] }
  0x17   : > { %336 = vperm.xlu0 %517, %v276_v4  }
  0x18   : > { %269 = vst.msk [vmem:[#allocation2] sm:$0xff] %vm268_vm0, %v267_v3  ;;  %v327_v27 = vld [vmem:[#allocation4] sm:$0xff] }
  0x19   : > { %v340_v28 = vld [vmem:[#allocation3] sm:$0xff] }
  0x1f   : > { %v275_v6 = vld [vmem:[#allocation2] sm:$0xff] }
  0x20   : > { %474 = vmatmul.msk.f32.vlgmr.msra.gmra.mxu0 %vm268_vm0, %v275_v6 }
  0x89   : > { %v337_v21 = vpop.permute.xlu0 %336 }
  0x8a   : > { %vm339_vm4 = vcmp.eq.s32.totalorder %v337_v21, %v518_v20 }
  0x9d   : > { %v321_v13 = vpop.f32.mrf.mxu0 }
  0x9e   : > { %v322_v14 = vadd.f32 %v321_v13, %v292_v11 }
  0xa0   : > { %v324_v17 = vmul.f32 1.442695, %v322_v14 }
  0xa2   : > { %519 = vpow2.f32 %v324_v17 }
  0xa8   : > { %v520_v22 = vpop.eup %519 }
  0xa9   : > { %v326_v23 = vsel %vm290_vm3, %v520_v22, 0.0 }
  0xaa   : > { %v329_v24 = vsel %vm328_vm5, %v326_v23, 0.0  ;;  %v341_v25 = vsel %vm339_vm4, %v326_v23, 0.0 }
  0xab   : > { %330 = vadd.xlane.f32.xlu0 %v329_v24  ;;  %v342_v26 = vsel %vm328_vm5, %v341_v25, 0.0 }
  0xac   : > { %343 = vadd.xlane.f32.xlu1 %v342_v26 }
 0x11e   : > { %v331_v29 = vpop.xlane.xlu0 %330 }
 0x11f   : > { %v332_v30 = vadd.f32 %v331_v29, %v327_v27  ;;  %v344_v31 = vpop.xlane.xlu1 %343 }
 0x120   : > { %v345_v32 = vadd.f32 %v344_v31, %v340_v28 }
 0x121   : > { %334 = vst.msk [vmem:[#allocation4] sm:$0xff] %vm270_vm1, %v332_v30 }
 0x122   : > { %346 = vst.msk [vmem:[#allocation3] sm:$0xff] %vm270_vm1, %v345_v32 }
 0x128   : > { %v352_v33 = vld [vmem:[#allocation4] sm:$0xff] }
 0x129   : > { %v353_v34 = vmax.f32 %v352_v33, 1e-30  ;;  %v350_v35 = vld [vmem:[#allocation3] sm:$0xff] }
 0x12a   : > { %v351_v36 = vmax.f32 %v350_v35, 1e-30 }
 0x12b   : > { %521 = vlog2.f32 %v353_v34 }
 0x12c   : > { %523 = vlog2.f32 %v351_v36 }
 0x131   : > { %v522_v37 = vpop.eup %521 }
 0x132   : > { %v524_v38 = vpop.eup %523  ;;  %v355_v39 = vmul.f32 0.6931472, %v522_v37 }
 0x133   : > { %v357_v40 = vmul.f32 0.6931472, %v524_v38 }
 0x135   : > { %v358_v41 = vsub.f32 %v355_v39, %v357_v40 }
 0x137   : > { %359 = vst.msk [vmem:[%s261_s18] sm:$0xff] %vm270_vm1, %v358_v41 }
 0x138 PF: > { %s15_s17 = sadd.s32 1, %s581_s17   ;;  %s680_s15 = smov %s577_s16 }
 0x139   : > { %p12_p8 = scmp.ge.s32.totalorder %s15_s17, 4   ;;  %s681_s16 = smov %s683_s19 }
 0x13b   :  { %14 = sbr.rel (!%p12_p8) target bundleno = 2 (0x2), region = 86 }
 0x140   :  { %379 = vsyncpa [#allocation6], 1 }
 0x141   :  { %381 = vsyncpa [#allocation6 + $0x1], 1 }

</bundles_post_ra>
